<compile_context>
chip_gen: v5e
topology: v5e:2x2
jax: 0.10.0
libtpu: 0.0.40
codegen_flags: <defaults>
</compile_context>

<pallas_src>
import functools
import math

import jax
import jax.numpy as jnp
from jax import lax
from jax.experimental import pallas as pl
from jax.experimental.pallas import tpu as pltpu


def _attn_kernel(qkv_ref, o_ref, *, attn_ch, heads_per_block, scale_sq):
    """One grid step: `heads_per_block` heads of one batch row.

    qkv_ref: (1, T, G*3*C)  — per head the channels are [q(C) | k(C) | v(C)]
    o_ref:   (1, T, G*C)
    """
    qkv = qkv_ref[0]  # (T, G*3*C), stays in the input dtype
    outs = []
    for g in range(heads_per_block):  # static unroll over heads in the block
        base = g * 3 * attn_ch
        q = qkv[:, base:base + attn_ch]
        k = qkv[:, base + attn_ch:base + 2 * attn_ch]
        v = qkv[:, base + 2 * attn_ch:base + 3 * attn_ch]

        # scores = q @ k^T, contracting the channel axis of both operands
        # (no explicit transpose); f32 accumulation on the MXU.
        s = lax.dot_general(
            q, k, (((1,), (1,)), ((), ())), preferred_element_type=jnp.float32)

        # softmax over keys; scale^2 = 1/sqrt(C) applied once inside the
        # stabilized exponent (scale_sq > 0, so the max-shift stays valid).
        m = jnp.max(s, axis=-1, keepdims=True)
        p = jnp.exp((s - m) * scale_sq)
        denom = jnp.sum(p, axis=-1, keepdims=True)
        p = p * pl.reciprocal(denom, approx=True)

        # out = softmax(scores) @ v ; operands back in the input dtype for the MXU.
        o = jnp.dot(p.astype(v.dtype), v, preferred_element_type=jnp.float32)
        outs.append(o)

    # Single lane-dense store of the whole output block.
    o_ref[0] = jnp.concatenate(outs, axis=-1).astype(o_ref.dtype)


def _pick_heads_per_block(heads, attn_ch, n_ctx, itemsize,
                          budget_bytes=24 * 1024 * 1024):
    """Largest head-group G (dividing `heads`) whose blocks are 128-lane aligned and
    fit a conservative VMEM budget (double-buffered in/out + two live f32 TxT tiles).
    Falls back to G = heads: then both blocks span the full width, which is always
    layout-legal regardless of 128-alignment."""
    def fits(g):
        in_block = n_ctx * g * 3 * attn_ch * itemsize
        out_block = n_ctx * g * attn_ch * itemsize
        score = n_ctx * n_ctx * 4  # f32 scores / probs live at a time
        return 2 * (in_block + out_block) + 2 * score <= budget_bytes

    for g in range(heads, 0, -1):
        if heads % g == 0 and (g * attn_ch) % 128 == 0 and fits(g):
            return g
    return heads


def qkv_multihead_attention(qkv: jax.Array, heads: int) -> jax.Array:
    """Reproduces QKVMultiheadAttention.forward (use_flash_attn=False, eval mode)."""
    bs, n_ctx, width = qkv.shape
    assert width % (3 * heads) == 0
    attn_ch = width // heads // 3
    scale_sq = 1.0 / math.sqrt(attn_ch)  # == (1/sqrt(sqrt(C)))^2

    g = _pick_heads_per_block(heads, attn_ch, n_ctx, qkv.dtype.itemsize)
    n_hgroups = heads // g

    # qkv is read in place: block = all of n_ctx, G consecutive heads' channels.
    in_spec = pl.BlockSpec((1, n_ctx, g * 3 * attn_ch), lambda b, h: (b, 0, h))
    # Output is written directly in the final (bs, n_ctx, heads*attn_ch) layout.
    out_spec = pl.BlockSpec((1, n_ctx, g * attn_ch), lambda b, h: (b, 0, h))

    kernel = functools.partial(
        _attn_kernel, attn_ch=attn_ch, heads_per_block=g, scale_sq=scale_sq)

    return pl.pallas_call(
        kernel,
        out_shape=jax.ShapeDtypeStruct((bs, n_ctx, heads * attn_ch), qkv.dtype),
        grid_spec=pltpu.PrefetchScalarGridSpec(
            num_scalar_prefetch=0,
            grid=(bs, n_hgroups),
            in_specs=[in_spec],
            out_specs=out_spec,
        ),
        compiler_params=pltpu.CompilerParams(
            dimension_semantics=("parallel", "parallel"),
            vmem_limit_bytes=48 * 1024 * 1024,  # under v7x's 64 MiB physical VMEM
        ),
    )(qkv)


def _reference(qkv: jax.Array, heads: int) -> jax.Array:
    # Pure-JAX mirror of the PyTorch non-flash path (dropout disabled / eval mode).
    bs, n_ctx, width = qkv.shape
    attn_ch = width // heads // 3
    scale = 1.0 / math.sqrt(math.sqrt(attn_ch))
    qkv_r = qkv.reshape(bs, n_ctx, heads, 3 * attn_ch)
    q, k, v = jnp.split(qkv_r, 3, axis=-1)
    w = jnp.einsum("bthc,bshc->bhts", q * scale, k * scale)
    w = jax.nn.softmax(w, axis=-1)
    out = jnp.einsum("bhts,bshc->bthc", w, v)
    return out.reshape(bs, n_ctx, -1)


if __name__ == "__main__":
    # Small shapes consistent with the module: bs=2, n_ctx=8, heads=4, attn_ch=8
    # => width = heads * 3 * attn_ch = 96.
    bs, n_ctx, heads, attn_ch = 2, 8, 4, 8
    width = heads * 3 * attn_ch

    key = jax.random.PRNGKey(0)
    qkv = jax.random.normal(key, (bs, n_ctx, width), dtype=jnp.float32)

    out = jax.block_until_ready(qkv_multihead_attention(qkv, heads))

    ref = _reference(qkv, heads)
    assert out.shape == (bs, n_ctx, heads * attn_ch)
    # approx=True reciprocal (EUP) introduces ~1e-4 relative error vs the exact divide.
    assert jnp.allclose(out, ref, atol=2e-3, rtol=2e-3), "mismatch vs reference"

    print("KERNEL_OK")
</pallas_src>

<mosaic_0001>
module attributes {stable_mosaic.version = 11 : i64} {
  func.func @_attn_kernel(%arg0: i32, %arg1: i32, %arg2: memref<1x8x96xf32, #tpu.memory_space<vmem>>, %arg3: memref<1x8x32xf32, #tpu.memory_space<vmem>>) attributes {dimension_semantics = [#tpu.dimension_semantics<parallel>, #tpu.dimension_semantics<parallel>], iteration_bounds = array<i64: 2, 1>, scalar_prefetch = 0 : i64, scratch_operands = 0 : i64, tpu.core_type = #tpu.core_type<tc>, window_params = [{transform_indices = @transform_0, window_bounds = array<i64: 1, 8, 96>}, {transform_indices = @transform_1, window_bounds = array<i64: 1, 8, 32>}]} {
    %c0 = arith.constant 0 : index
    %c0_0 = arith.constant 0 : index
    %c0_1 = arith.constant 0 : index
    %0 = vector.load %arg2[%c0, %c0_0, %c0_1] : memref<1x8x96xf32, #tpu.memory_space<vmem>>, vector<1x8x96xf32>
    %1 = vector.shape_cast %0 : vector<1x8x96xf32> to vector<8x96xf32>
    %2 = vector.extract_strided_slice %1 {offsets = [0, 0], sizes = [8, 8], strides = [1, 1]} : vector<8x96xf32> to vector<8x8xf32>
    %3 = vector.extract_strided_slice %1 {offsets = [0, 8], sizes = [8, 8], strides = [1, 1]} : vector<8x96xf32> to vector<8x8xf32>
    %4 = vector.extract_strided_slice %1 {offsets = [0, 16], sizes = [8, 8], strides = [1, 1]} : vector<8x96xf32> to vector<8x8xf32>
    %cst = arith.constant dense<0.000000e+00> : vector<8x8xf32>
    %5 = tpu.matmul %2, %3, %cst {dimension_numbers = #tpu.dot_dimension_numbers<[1], [1], [0], [0], [0, 0, 1, 0], [], []>} : vector<8x8xf32>, vector<8x8xf32>, vector<8x8xf32> -> vector<8x8xf32>
    %cst_2 = arith.constant dense<0xFF800000> : vector<8xf32>
    %6 = vector.multi_reduction <maximumf>, %5, %cst_2 [1] : vector<8x8xf32> to vector<8xf32>
    %7 = vector.shape_cast %6 : vector<8xf32> to vector<8x1xf32>
    %8 = vector.broadcast %7 : vector<8x1xf32> to vector<8x8xf32>
    %9 = arith.subf %5, %8 : vector<8x8xf32>
    %cst_3 = arith.constant 0.353553385 : f32
    %10 = vector.broadcast %cst_3 : f32 to vector<8x8xf32>
    %11 = arith.mulf %9, %10 : vector<8x8xf32>
    %12 = math.exp %11 : vector<8x8xf32>
    %cst_4 = arith.constant dense<0.000000e+00> : vector<8xf32>
    %13 = vector.multi_reduction <add>, %12, %cst_4 [1] : vector<8x8xf32> to vector<8xf32>
    %14 = vector.shape_cast %13 : vector<8xf32> to vector<8x1xf32>
    %15 = tpu.reciprocal %14 {approx = true} : vector<8x1xf32> -> vector<8x1xf32>
    %16 = vector.broadcast %15 : vector<8x1xf32> to vector<8x8xf32>
    %17 = arith.mulf %12, %16 : vector<8x8xf32>
    %cst_5 = arith.constant dense<0.000000e+00> : vector<8x8xf32>
    %18 = tpu.matmul %17, %4, %cst_5 {dimension_numbers = #tpu.dot_dimension_numbers<[1], [0], [0], [1], [0, 0, 1, 1], [], []>} : vector<8x8xf32>, vector<8x8xf32>, vector<8x8xf32> -> vector<8x8xf32>
    %19 = vector.extract_strided_slice %1 {offsets = [0, 24], sizes = [8, 8], strides = [1, 1]} : vector<8x96xf32> to vector<8x8xf32>
    %20 = vector.extract_strided_slice %1 {offsets = [0, 32], sizes = [8, 8], strides = [1, 1]} : vector<8x96xf32> to vector<8x8xf32>
    %21 = vector.extract_strided_slice %1 {offsets = [0, 40], sizes = [8, 8], strides = [1, 1]} : vector<8x96xf32> to vector<8x8xf32>
    %cst_6 = arith.constant dense<0.000000e+00> : vector<8x8xf32>
    %22 = tpu.matmul %19, %20, %cst_6 {dimension_numbers = #tpu.dot_dimension_numbers<[1], [1], [0], [0], [0, 0, 1, 0], [], []>} : vector<8x8xf32>, vector<8x8xf32>, vector<8x8xf32> -> vector<8x8xf32>
    %cst_7 = arith.constant dense<0xFF800000> : vector<8xf32>
    %23 = vector.multi_reduction <maximumf>, %22, %cst_7 [1] : vector<8x8xf32> to vector<8xf32>
    %24 = vector.shape_cast %23 : vector<8xf32> to vector<8x1xf32>
    %25 = vector.broadcast %24 : vector<8x1xf32> to vector<8x8xf32>
    %26 = arith.subf %22, %25 : vector<8x8xf32>
    %cst_8 = arith.constant 0.353553385 : f32
    %27 = vector.broadcast %cst_8 : f32 to vector<8x8xf32>
    %28 = arith.mulf %26, %27 : vector<8x8xf32>
    %29 = math.exp %28 : vector<8x8xf32>
    %cst_9 = arith.constant dense<0.000000e+00> : vector<8xf32>
    %30 = vector.multi_reduction <add>, %29, %cst_9 [1] : vector<8x8xf32> to vector<8xf32>
    %31 = vector.shape_cast %30 : vector<8xf32> to vector<8x1xf32>
    %32 = tpu.reciprocal %31 {approx = true} : vector<8x1xf32> -> vector<8x1xf32>
    %33 = vector.broadcast %32 : vector<8x1xf32> to vector<8x8xf32>
    %34 = arith.mulf %29, %33 : vector<8x8xf32>
    %cst_10 = arith.constant dense<0.000000e+00> : vector<8x8xf32>
    %35 = tpu.matmul %34, %21, %cst_10 {dimension_numbers = #tpu.dot_dimension_numbers<[1], [0], [0], [1], [0, 0, 1, 1], [], []>} : vector<8x8xf32>, vector<8x8xf32>, vector<8x8xf32> -> vector<8x8xf32>
    %36 = vector.extract_strided_slice %1 {offsets = [0, 48], sizes = [8, 8], strides = [1, 1]} : vector<8x96xf32> to vector<8x8xf32>
    %37 = vector.extract_strided_slice %1 {offsets = [0, 56], sizes = [8, 8], strides = [1, 1]} : vector<8x96xf32> to vector<8x8xf32>
    %38 = vector.extract_strided_slice %1 {offsets = [0, 64], sizes = [8, 8], strides = [1, 1]} : vector<8x96xf32> to vector<8x8xf32>
    %cst_11 = arith.constant dense<0.000000e+00> : vector<8x8xf32>
    %39 = tpu.matmul %36, %37, %cst_11 {dimension_numbers = #tpu.dot_dimension_numbers<[1], [1], [0], [0], [0, 0, 1, 0], [], []>} : vector<8x8xf32>, vector<8x8xf32>, vector<8x8xf32> -> vector<8x8xf32>
    %cst_12 = arith.constant dense<0xFF800000> : vector<8xf32>
    %40 = vector.multi_reduction <maximumf>, %39, %cst_12 [1] : vector<8x8xf32> to vector<8xf32>
    %41 = vector.shape_cast %40 : vector<8xf32> to vector<8x1xf32>
    %42 = vector.broadcast %41 : vector<8x1xf32> to vector<8x8xf32>
    %43 = arith.subf %39, %42 : vector<8x8xf32>
    %cst_13 = arith.constant 0.353553385 : f32
    %44 = vector.broadcast %cst_13 : f32 to vector<8x8xf32>
    %45 = arith.mulf %43, %44 : vector<8x8xf32>
    %46 = math.exp %45 : vector<8x8xf32>
    %cst_14 = arith.constant dense<0.000000e+00> : vector<8xf32>
    %47 = vector.multi_reduction <add>, %46, %cst_14 [1] : vector<8x8xf32> to vector<8xf32>
    %48 = vector.shape_cast %47 : vector<8xf32> to vector<8x1xf32>
    %49 = tpu.reciprocal %48 {approx = true} : vector<8x1xf32> -> vector<8x1xf32>
    %50 = vector.broadcast %49 : vector<8x1xf32> to vector<8x8xf32>
    %51 = arith.mulf %46, %50 : vector<8x8xf32>
    %cst_15 = arith.constant dense<0.000000e+00> : vector<8x8xf32>
    %52 = tpu.matmul %51, %38, %cst_15 {dimension_numbers = #tpu.dot_dimension_numbers<[1], [0], [0], [1], [0, 0, 1, 1], [], []>} : vector<8x8xf32>, vector<8x8xf32>, vector<8x8xf32> -> vector<8x8xf32>
    %53 = vector.extract_strided_slice %1 {offsets = [0, 72], sizes = [8, 8], strides = [1, 1]} : vector<8x96xf32> to vector<8x8xf32>
    %54 = vector.extract_strided_slice %1 {offsets = [0, 80], sizes = [8, 8], strides = [1, 1]} : vector<8x96xf32> to vector<8x8xf32>
    %55 = vector.extract_strided_slice %1 {offsets = [0, 88], sizes = [8, 8], strides = [1, 1]} : vector<8x96xf32> to vector<8x8xf32>
    %cst_16 = arith.constant dense<0.000000e+00> : vector<8x8xf32>
    %56 = tpu.matmul %53, %54, %cst_16 {dimension_numbers = #tpu.dot_dimension_numbers<[1], [1], [0], [0], [0, 0, 1, 0], [], []>} : vector<8x8xf32>, vector<8x8xf32>, vector<8x8xf32> -> vector<8x8xf32>
    %cst_17 = arith.constant dense<0xFF800000> : vector<8xf32>
    %57 = vector.multi_reduction <maximumf>, %56, %cst_17 [1] : vector<8x8xf32> to vector<8xf32>
    %58 = vector.shape_cast %57 : vector<8xf32> to vector<8x1xf32>
    %59 = vector.broadcast %58 : vector<8x1xf32> to vector<8x8xf32>
    %60 = arith.subf %56, %59 : vector<8x8xf32>
    %cst_18 = arith.constant 0.353553385 : f32
    %61 = vector.broadcast %cst_18 : f32 to vector<8x8xf32>
    %62 = arith.mulf %60, %61 : vector<8x8xf32>
    %63 = math.exp %62 : vector<8x8xf32>
    %cst_19 = arith.constant dense<0.000000e+00> : vector<8xf32>
    %64 = vector.multi_reduction <add>, %63, %cst_19 [1] : vector<8x8xf32> to vector<8xf32>
    %65 = vector.shape_cast %64 : vector<8xf32> to vector<8x1xf32>
    %66 = tpu.reciprocal %65 {approx = true} : vector<8x1xf32> -> vector<8x1xf32>
    %67 = vector.broadcast %66 : vector<8x1xf32> to vector<8x8xf32>
    %68 = arith.mulf %63, %67 : vector<8x8xf32>
    %cst_20 = arith.constant dense<0.000000e+00> : vector<8x8xf32>
    %69 = tpu.matmul %68, %55, %cst_20 {dimension_numbers = #tpu.dot_dimension_numbers<[1], [0], [0], [1], [0, 0, 1, 1], [], []>} : vector<8x8xf32>, vector<8x8xf32>, vector<8x8xf32> -> vector<8x8xf32>
    %70 = tpu.concatenate %18, %35, %52, %69 in 1 : vector<8x8xf32>, vector<8x8xf32>, vector<8x8xf32>, vector<8x8xf32> -> vector<8x32xf32>
    %c0_21 = arith.constant 0 : index
    %c0_22 = arith.constant 0 : index
    %c0_23 = arith.constant 0 : index
    %71 = vector.load %arg3[%c0_21, %c0_22, %c0_23] : memref<1x8x32xf32, #tpu.memory_space<vmem>>, vector<1x8x32xf32>
    %72 = vector.shape_cast %71 : vector<1x8x32xf32> to vector<8x32xf32>
    %73 = vector.shape_cast %70 : vector<8x32xf32> to vector<1x8x32xf32>
    tpu.vector_store %arg3[%c0_21, %c0_22, %c0_23], %73 {strides = array<i32>} : memref<1x8x32xf32, #tpu.memory_space<vmem>>, vector<1x8x32xf32>,
    return
  }
  func.func @transform_0(%arg0: i32, %arg1: i32) -> (i32, i32, i32) {
    %c0_i32 = arith.constant 0 : i32
    %c0_i32_0 = arith.constant 0 : i32
    return %arg0, %c0_i32, %arg1 : i32, i32, i32
  }
  func.func @transform_1(%arg0: i32, %arg1: i32) -> (i32, i32, i32) {
    %c0_i32 = arith.constant 0 : i32
    %c0_i32_0 = arith.constant 0 : i32
    return %arg0, %c0_i32, %arg1 : i32, i32, i32
  }
}

</mosaic_0001>

<bundles_post_ra>
// kernel: tpu_custom_call.1
= control target key start
LH: loop header
LB: loop body
LE: loop exit
PB: predicated region body
PF: predicated region fallthrough
CT: control target
= control target key end

     0   :  { %6 = vsyncpa [#allocation3], 0  ;;  %s949_s0 = inlined_call_operand.hbm [shape: f32[2,8,96], index: 0, kind: input, shape index: {}]   ;;  %s950_s1 = inlined_call_operand.hbm [shape: f32[2,8,32], index: 1, kind: output, shape index: {}]  }
   0x1   :  { %8 = vsyncpa [#allocation3 + $0x1], 0 }
   0x2   :  { %9 = vsyncpa [#allocation4], 0 }
   0x3   :  { %11 = vsyncpa [#allocation4 + $0x1], 0  ;;  %s787_s6 = smov 0   ;;  %s789_s7 = smov 0  }
   0x4   :  { %s791_s8 = smov 0   ;;  %s793_s9 = smov 0  }
   0x5   :  { %s795_s10 = smov 0   ;;  %s797_s11 = smov 0  }
   0x6 LB: > { %s532_s12 = sadd.s32 4294967295, %s761_s11   ;;  %s533_s13 = sadd.s32 4294967294, %s761_s11   ;;  %s761_s11 = sphi %s797_s11, %s17_s11   ;;  %s757_s10 = sphi %s795_s10, %s959_s10   ;;  %s753_s9 = sphi %s793_s9, %s958_s9   ;;  %s749_s8 = sphi %s791_s8, %s957_s8   ;;  %s745_s7 = sphi %s789_s7, %s956_s7   ;;  %s741_s6 = sphi %s787_s6, %s955_s6  }
   0x7   : > { %s29_s14 = sadd.s32 1, %s757_s10  ;;  %s38_s15 = sadd.s32 1, %s749_s8 }
   0x8   : > { %p31_p0 = scmp.ge.s32.totalorder %s29_s14, 2  ;;  %p45_p1 = scmp.ne.s32.totalorder %s749_s8, %s745_s7 }
   0x9   : > { %p46_p2 = scmp.eq.s32.totalorder %s761_s11, 0  ;;  %p51_p3 = scmp.ne.s32.totalorder %s745_s7, %s741_s6 }
   0xa   : > { %s961_s14 = smov (%p31_p0, %s29_s14), 0  ;;  %p52_p5 = scmp.eq.s32.totalorder %s532_s12, 0 }
   0xb   : > { %p828_p4 = por %p46_p2, %p45_p1  ;;  %s33_s17 = ssub.s32 %s757_s10, %s961_s14 }
   0xc   : > { %p77_p6 = scmp.eq.s32.totalorder %s532_s12, 1  ;;  %p36_p7 = scmp.eq.s32.totalorder %s33_s17, 0 }
   0xd   : > { %p834_p8 = por %p52_p5, %p51_p3  ;;  %p83_p10 = scmp.eq.s32.totalorder %s533_s13, 1 }
   0xe   : > { %p838_p9 = por %p77_p6, %p45_p1  ;;  %p535_p12 = scmp.ge.s32.totalorder %s761_s11, 2 }
   0xf   : > { %s843_s20 = scalar_select %p36_p7, %s749_s8, %s38_s15  }
  0x10   : > { %p845_p11 = por %p83_p10, %p51_p3  ;;  %p569_p13 = scmp.lt.s32.totalorder %s761_s11, 2 }
  0x11   : > { %s103_s22 = sand.u32 1, %s749_s8   ;;  %s537_s24 = sshll.u32 %s757_s10, 3 }
  0x12   : > { %s536_s23 = sshll.u32 %s103_s22, 3  ;;  %s112_s27 = scalar_lea.hbm %s949_s0, %s537_s24 }
  0x13   : > { %s107_s28 = scalar_lea.vmem [#allocation2], %s536_s23  ;;  %s114_s30 = sshll.u32 %s112_s27, 4  ;;  %s115_s30 = int_to_ptr.hbm [resolvable:$true] %s114_s30 }
  0x14   : > { %s116_s29 = sshll.u32 %s107_s28, 4  ;;  %p562_p0 = pnand %p569_p13, %p828_p4  ;;  %s117_s29 = int_to_ptr.vmem [resolvable:$true] %s116_s29 }
  0x15   : > { %p538_p1 = scmp.ge.s32.totalorder %s761_s11, 1  ;;  %p121_p2 = scmp.lt.s32.totalorder %s761_s11, 3 }
  0x16   : > { %s104_s2 = scalar_lea.sflag [#allocation3], %s103_s22 }
  0x17   : > { %564 = dma.hbm_to_vmem [thread:$0]  (!%p562_p0), %s115_s30, 128, %s117_s29, %s104_s2  }
  0x18   : > { %p122_p3 = pnand %p538_p1, %p121_p2 }
  0x19   : > { %s861_s3 = sand.u32 (!%p122_p3), 1, %s745_s7  }
  0x1a   : > { %125 = sbr.rel (%p122_p3) target bundleno = 1194 (0x4aa), region = 24  ;;  %s539_s4 = sshll.u32 (!%p122_p3), %s861_s3, 3 }
  0x1b   : > { %s128_s5 = scalar_lea.sflag (!%p122_p3), [#allocation3], %s861_s3  ;;  %s131_s12 = scalar_lea.vmem (!%p122_p3), [#allocation2], %s539_s4 }
  0x1f   : > { %732 = dma.done.wait (%p834_p8), %s128_s5, 128  }
  0x20   : > { %734 = vsyncadd (%p834_p8), %s128_s5, 4294967168  ;;  %v871_v0 = vld [vmem:[%s131_s12] sm:$0xff]  ;;  %s763_s13 = smov 120   ;;  %s764_s15 = smov 96   ;;  %vm155_vm0 = vcmask 64512   ;;  %vm429_vm1 = vcmask 130048  }
  0x21   : > { %153 = vrot.lane.b32.xlu0 %v871_v0, %s763_s13  ;;  %220 = vrot.lane.b32.xlu1 %v871_v0, %s764_s15  ;;  %s765_s16 = smov 104   ;;  %s766_s17 = smov 112   ;;  %vm431_vm2 = vcmask 195584   ;;  %vm433_vm3 = vcmask 261120  }
  0x22   : > { %218 = vrot.lane.b32.xlu2 %v871_v0, %s765_s16  ;;  %s767_s18 = smov 72   ;;  %s768_s22 = smov 48  }
  0x23   : > { %s769_s23 = smov 80   ;;  %s770_s24 = smov 56  }
  0x24   : > { %s771_s25 = smov 64   ;;  %s772_s26 = smov 88  }
  0x25   : > { %s773_s27 = smov 40   ;;  %s774_s28 = smov 24  }
  0x26   : > { %s775_s29 = smov 8   ;;  %s776_s30 = smov 16  }
  0x27   : > { %s554_s2 = sshll.u32 %s753_s9, 3  ;;  %s150_s15 = scalar_lea.vmem [#allocation5], %s539_s4 }
  0x28   : > { %s447_s13 = scalar_lea.hbm %s950_s1, %s554_s2  ;;  %s449_s16 = sshll.u32 %s150_s15, 4  ;;  %s450_s16 = int_to_ptr.vmem [resolvable:$true] %s449_s16 }
  0x29   : > { %s436_s9 = scalar_lea.sflag [#allocation4], %s861_s3 }
  0x2a   : > { %192 = vrot.lane.b32.xlu2 %v871_v0, %s766_s17  ;;  %s451_s17 = sshll.u32 %s447_s13, 4  ;;  %s452_s17 = int_to_ptr.hbm [resolvable:$true] %s451_s17 }
  0x32   : > { %286 = vrot.lane.b32.xlu2 %v871_v0, %s767_s18  ;;  %s693_s18 = sshra.s32 %s452_s17, 4  ;;  %s694_s18 = int_to_ptr.hbm [resolvable:$true] %s693_s18 }
  0x33   : > { %p700_p7 = scmp.lt.s32.totalorder %s694_s18, %s950_s1 }
  0x3a   : > { %352 = vrot.lane.b32.xlu2 %v871_v0, %s768_s22  ;;  %s695_s22 = scalar_lea.hbm %s694_s18, 8 }
  0x3b   : > { %p696_p4 = scmp.ne.s32.totalorder %s694_s18, %s695_s22 }
  0x3d   : > { %p697_p5 = pnand %p696_p4, %p838_p9 }
  0x3f   : > { %p698_p6 = pneg %p697_p5 }
  0x42   : > { %284 = vrot.lane.b32.xlu2 %v871_v0, %s769_s23 }
  0x7c   : > { %v219_v3 = vpop.permute.xlu2 %218 }
  0x84   : > { %v193_v10 = vpop.permute.xlu2 %192 }
  0x85   : > { %213 = vmatpush.msra.mxu1 %v193_v10 }
  0x8c   : > { %v287_v14 = vpop.permute.xlu2 %286 }
  0x8d   : > { %547 = vmatpush.xpose.msk.msrb.mxu1 %vm155_vm0, %v287_v14 }
  0x93   : > { %v154_v1 = vpop.permute.xlu0 %153  ;;  %v221_v2 = vpop.permute.xlu1 %220 }
  0x94   : > { %541 = vmatpush.xpose.msk.msra.mxu0 %vm155_vm0, %v154_v1  ;;  %544 = vmatpush.xpose.msk.msra.mxu2 %vm155_vm0, %v221_v2  ;;  %v353_v16 = vpop.permute.xlu2 %352 }
  0x97   : > { %542 = vmatmul.msk.f32.vlgmr.msra.gmra.mxu0 %vm155_vm0, %v871_v0  ;;  %545 = vmatmul.msk.f32.vlgmr.msra.gmra.mxu2 %vm155_vm0, %v219_v3 }
  0x98   : > { %550 = vmatpush.xpose.msk.msrb.mxu0 %vm155_vm0, %v353_v16 }
  0x9c   : > { %v285_v20 = vpop.permute.xlu2 %284 }
 0x114   : > { %v177_v4 = vpop.f32.mrf.mxu0 }
 0x115   : > { %v180_v5 = vsel %vm155_vm0, %v177_v4, -inf }
 0x116   : > { %181 = vmax.xlane.f32.xlu0 %v180_v5 }
 0x11a   : > { %v243_v13 = vpop.f32.mrf.mxu2 }
 0x11b   : > { %v246_v15 = vsel %vm155_vm0, %v243_v13, -inf }
 0x11c   : > { %247 = vmax.xlane.f32.xlu2 %v246_v15 }
 0x189   : > { %v182_v6 = vpop.xlane.xlu0 %181 }
 0x18a   : > { %v183_v7 = vsub.f32 %v177_v4, %v182_v6 }
 0x18c   : > { %v184_v8 = vmul.f32 0.35355338, %v183_v7 }
 0x18e   : > { %v185_v9 = vmul.f32 1.442695, %v184_v8 }
 0x18f   : > { %v248_v22 = vpop.xlane.xlu2 %247 }
 0x190   : > { %633 = vpow2.f32 %v185_v9  ;;  %v249_v24 = vsub.f32 %v243_v13, %v248_v22 }
 0x192   : > { %v250_v25 = vmul.f32 0.35355338, %v249_v24 }
 0x194   : > { %v251_v28 = vmul.f32 1.442695, %v250_v25 }
 0x196   : > { %v634_v11 = vpop.eup %633 }
 0x197   : > { %v187_v12 = vsel %vm155_vm0, %v634_v11, 0.0 }
 0x198   : > { %188 = vadd.xlane.f32.xlu1 %v187_v12 }
 0x1b1   : > { %350 = vrot.lane.b32.xlu1 %v871_v0, %s770_s24  ;;  %s699_s24 = scalar_lea.hbm %s950_s1, 16 }
 0x1b2   : > { %p701_p8 = scmp.lt.s32.totalorder %s699_s24, %s695_s22 }
 0x1b4   : > { %p702_p10 = por %p701_p8, %p700_p7 }
 0x1b6   : > { %p703_p13 = pnand %p702_p10, %p698_p6 }
 0x20b   : > { %v189_v17 = vpop.xlane.xlu1 %188 }
 0x20c   : > { %635 = vrcp.f32 %v189_v17 }
 0x20d   : > { %637 = vpow2.f32 %v251_v28 }
 0x212   : > { %v636_v18 = vpop.eup %635 }
 0x213   : > { %v191_v19 = vmul.f32 %v636_v18, %v634_v11  ;;  %v638_v31 = vpop.eup %637 }
 0x214   : > { %v253_v32 = vsel %vm155_vm0, %v638_v31, 0.0 }
 0x215   : > { %543 = vmatmul.msk.f32.vlgmr.msra.gmra.mxu1 %vm155_vm0, %v191_v19 }
 0x21d   : > { %548 = vmatmul.msk.f32.vlgmr.msrb.gmra.mxu1 %vm155_vm0, %v285_v20 }
 0x223   : > { %v351_v21 = vpop.permute.xlu1 %350 }
 0x224   : > { %551 = vmatmul.msk.f32.vlgmr.msrb.gmra.mxu0 %vm155_vm0, %v351_v21 }
 0x292   : > { %v894_v23 = vpop.f32.mrf.mxu1 }
 0x29a   : > { %v309_v26 = vpop.f32.mrf.mxu1 }
 0x29b   : > { %v312_v27 = vsel %vm155_vm0, %v309_v26, -inf }
 0x29c   : > { %313 = vmax.xlane.f32.xlu1 %v312_v27 }
 0x2a1   : > { %v375_v29 = vpop.f32.mrf.mxu0 }
 0x2a2   : > { %v378_v30 = vsel %vm155_vm0, %v375_v29, -inf }
 0x2a3   : > { %379 = vmax.xlane.f32.xlu0 %v378_v30 }
 0x2ab   : > { %254 = vadd.xlane.f32.xlu0 %v253_v32 }
 0x2b5   : > { %324 = vrot.lane.b32.xlu1 %v871_v0, %s771_s25 }
 0x30f   : > { %v314_v33 = vpop.xlane.xlu1 %313 }
 0x310   : > { %v315_v34 = vsub.f32 %v309_v26, %v314_v33 }
 0x312   : > { %v316_v35 = vmul.f32 0.35355338, %v315_v34 }
 0x314   : > { %v317_v36 = vmul.f32 1.442695, %v316_v35 }
 0x316   : > { %639 = vpow2.f32 %v317_v36  ;;  %v380_v37 = vpop.xlane.xlu0 %379 }
 0x317   : > { %v381_v38 = vsub.f32 %v375_v29, %v380_v37 }
 0x319   : > { %v382_v39 = vmul.f32 0.35355338, %v381_v38 }
 0x31b   : > { %v383_v40 = vmul.f32 1.442695, %v382_v39 }
 0x31c   : > { %v640_v41 = vpop.eup %639 }
 0x31d   : > { %641 = vpow2.f32 %v383_v40  ;;  %v319_v42 = vsel %vm155_vm0, %v640_v41, 0.0 }
 0x31e   : > { %320 = vadd.xlane.f32.xlu0 %v319_v42  ;;  %v255_v45 = vpop.xlane.xlu0 %254 }
 0x323   : > { %v642_v43 = vpop.eup %641 }
 0x324   : > { %v385_v44 = vsel %vm155_vm0, %v642_v43, 0.0 }
 0x325   : > { %386 = vadd.xlane.f32.xlu2 %v385_v44 }
 0x327   : > { %v325_v53 = vpop.permute.xlu1 %324 }
 0x332   : > { %258 = vrot.lane.b32.xlu0 %v871_v0, %s772_s26 }
 0x33d   : > { %390 = vrot.lane.b32.xlu2 %v871_v0, %s773_s27 }
 0x391   : > { %v321_v47 = vpop.xlane.xlu0 %320 }
 0x398   : > { %v387_v46 = vpop.xlane.xlu2 %386 }
 0x399   : > { %643 = vrcp.f32 %v387_v46 }
 0x39a   : > { %645 = vrcp.f32 %v255_v45 }
 0x39b   : > { %647 = vrcp.f32 %v321_v47 }
 0x39f   : > { %v644_v48 = vpop.eup %643 }
 0x3a0   : > { %v391_v49 = vpop.permute.xlu2 %390  ;;  %v389_v50 = vmul.f32 %v644_v48, %v642_v43  ;;  %v646_v51 = vpop.eup %645 }
 0x3a1   : > { %411 = vmatpush.msrb.mxu2 %v391_v49  ;;  %v257_v54 = vmul.f32 %v646_v51, %v638_v31  ;;  %v648_v55 = vpop.eup %647 }
 0x3a2   : > { %552 = vmatmul.msk.f32.vlgmr.msrb.gmra.mxu2 %vm155_vm0, %v389_v50  ;;  %v323_v56 = vmul.f32 %v648_v55, %v640_v41 }
 0x3a4   : > { %v259_v52 = vpop.permute.xlu0 %258 }
 0x3a5   : > { %279 = vmatpush.msra.mxu3 %v259_v52 }
 0x3a6   : > { %546 = vmatmul.msk.f32.vlgmr.msra.gmra.mxu3 %vm155_vm0, %v257_v54 }
 0x3a7   : > { %345 = vmatpush.msrb.mxu3 %v325_v53 }
 0x3ae   : > { %549 = vmatmul.msk.f32.vlgmr.msrb.gmra.mxu3 %vm155_vm0, %v323_v56 }
 0x425   : > { %v413_v57 = vpop.f32.mrf.mxu2 }
 0x426   : > { %425 = vrot.lane.b32.xlu1 %v413_v57, %s774_s28 }
 0x429   : > { %v281_v58 = vpop.f32.mrf.mxu3 }
 0x42a   : > { %417 = vrot.lane.b32.xlu0 %v281_v58, %s775_s29 }
 0x431   : > { %v347_v59 = vpop.f32.mrf.mxu3 }
 0x432   : > { %421 = vrot.lane.b32.xlu0 %v347_v59, %s776_s30 }
 0x498   : > { %v426_v63 = vpop.permute.xlu1 %425 }
 0x49c   : > { %v418_v60 = vpop.permute.xlu0 %417 }
 0x49d   : > { %v428_v61 = vsel %vm155_vm0, %v894_v23, %v418_v60 }
 0x4a4   : > { %v422_v62 = vpop.permute.xlu0 %421 }
 0x4a5   : > { %v430_v0 = vsel %vm429_vm1, %v428_v61, %v422_v62 }
 0x4a6   : > { %v432_v1 = vsel %vm431_vm2, %v430_v0, %v426_v63 }
 0x4a7   : > { %434 = vst.msk [vmem:[%s150_s15] sm:$0xff] %vm433_vm3, %v432_v1 }
 0x4a8   : > { %706 = shalt.err (!%p703_p13)
}
 0x4a9   : > { %559 = dma.vmem_to_hbm [thread:$0]  (%p838_p9), %s450_s16, 128, %s452_s17, %s436_s9  }
 0x4aa PF: > { %s463_s3 = sand.u32 1, %s741_s6   ;;  %p566_p0 = pnand %p535_p12, %p845_p11 }
 0x4ab   : > { %s464_s27 = scalar_lea.sflag [#allocation4], %s463_s3 }
 0x4ac   : > { %p567_p1 = pneg %p566_p0 }
 0x4ae   : > { %736 = dma.done.wait (%p567_p1), %s464_s27, 128  }
 0x4af   : > { %738 = vsyncadd (%p567_p1), %s464_s27, 4294967168  ;;  %s17_s11 = sadd.s32 1, %s761_s11   ;;  %s955_s6 = smov %s745_s7 }
 0x4b0   : > { %p14_p2 = scmp.ge.s32.totalorder %s17_s11, 4   ;;  %s956_s7 = smov %s749_s8 }
 0x4b1   : > { %s957_s8 = smov %s843_s20  ;;  %s958_s9 = smov %s757_s10 }
 0x4b2   : > { %s959_s10 = smov %s961_s14  ;;  %16 = sbr.rel (!%p14_p2) target bundleno = 6 (0x6), region = 69 }
 0x4b7   :  { %470 = vsyncpa [#allocation3], 1 }
 0x4b8   :  { %472 = vsyncpa [#allocation3 + $0x1], 1 }
 0x4b9   :  { %473 = vsyncpa [#allocation4], 1 }
 0x4ba   :  { %475 = vsyncpa [#allocation4 + $0x1], 1 }

</bundles_post_ra>
